<compile_context>
chip_gen: v5e
topology: v5e:2x2
jax: 0.10.0
libtpu: 0.0.40
codegen_flags: <defaults>
</compile_context>

<pallas_src>
import jax
import jax.numpy as jnp
from jax.experimental import pallas as pl
from jax.experimental.pallas import tpu as pltpu

H = 4                          # feature width of Linear / LayerNorm
GROUPS = 128 // H              # 32 rows interleaved along the 128-lane axis
LN_EPS = 1e-5                  # torch.nn.LayerNorm default eps
INV_SQRT2 = 0.7071067811865476


def _bert_ln_gelu_kernel(wh_ref, wl_ref, ones_ref, b_ref, g_ref, beta_ref, x_ref, o_ref):
    # wh_ref/wl_ref: (128,128) bf16 hi/lo parts of the block-diagonal centered weight
    # ones_ref:      (128,128) bf16 block-diagonal ones (group-sum + broadcast)
    # b_ref/g_ref/beta_ref: (1,128) f32, feature params tiled 32x along lanes
    # x_ref/o_ref:   (T, 128) f32, natural row-major view (32 rows x 4 features per sublane row)
    x = x_ref[...]
    x_hi = x.astype(jnp.bfloat16)
    x_lo = (x - x_hi.astype(jnp.float32)).astype(jnp.bfloat16)

    wh = wh_ref[...]
    wl = wl_ref[...]

    # Centered Linear on the MXU: d = (x @ W_bd') + b'   (4 bf16 passes ~ f32 accuracy).
    d = jnp.dot(x_hi, wh, preferred_element_type=jnp.float32)
    d = d + jnp.dot(x_lo, wh, preferred_element_type=jnp.float32)
    d = d + jnp.dot(x_hi, wl, preferred_element_type=jnp.float32)
    d = d + jnp.dot(x_lo, wl, preferred_element_type=jnp.float32)
    d = d + b_ref[...]                      # (1,128) broadcast; d is already mean-centered

    # Per-row variance: group-sum of d^2 over each 4-lane feature group via the MXU
    # (the ones block-diagonal both reduces and broadcasts back to all 4 lanes).
    d2 = d * d
    d2_hi = d2.astype(jnp.bfloat16)
    d2_lo = (d2 - d2_hi.astype(jnp.float32)).astype(jnp.bfloat16)
    ones_bd = ones_ref[...]
    ssq = jnp.dot(d2_hi, ones_bd, preferred_element_type=jnp.float32)
    ssq = ssq + jnp.dot(d2_lo, ones_bd, preferred_element_type=jnp.float32)

    inv = jax.lax.rsqrt(ssq * (1.0 / H) + LN_EPS)

    # Affine + exact (erf) GELU, full-slab, single dense store.
    yn = d * inv * g_ref[...] + beta_ref[...]
    out = 0.5 * yn * (1.0 + jax.lax.erf(yn * INV_SQRT2))
    o_ref[...] = out.astype(o_ref.dtype)


def bert_ln_gelu(x, w, b, gamma, beta, *, tile_s=1024):
    """x: (B, S, 4).  w: (4, 4) torch-layout weight (out, in).  Returns (B, S, 4)."""
    B, S, Hd = x.shape
    assert Hd == H
    R = B * S
    orig_dtype = x.dtype

    xf = x.reshape(R, H).astype(jnp.float32)

    # Lane-dense natural view (Rg, 128) requires R to be a multiple of 256 (=> Rg % 8 == 0).
    # Typical BERT shapes (B*S multiple of 256) take the zero-copy path; otherwise one small pad.
    r_pad = ((R + 255) // 256) * 256
    if r_pad != R:
        xf = jnp.pad(xf, ((0, r_pad - R), (0, 0)))
    rg = r_pad // GROUPS                      # sublane rows of the (Rg, 128) view; multiple of 8
    xg = xf.reshape(rg, 128)                  # free reshape, no data movement

    # ---- parameters (fold the LayerNorm mean-removal into W and b) ----
    w32 = w.astype(jnp.float32)
    b32 = b.astype(jnp.float32)
    w_c = w32 - jnp.mean(w32, axis=0, keepdims=True)     # remove column means (over out index)
    b_c = b32 - jnp.mean(b32)
    wbd = jnp.kron(jnp.eye(GROUPS, dtype=jnp.float32), w_c.T)        # (128,128) block-diag
    wbd_hi = wbd.astype(jnp.bfloat16)
    wbd_lo = (wbd - wbd_hi.astype(jnp.float32)).astype(jnp.bfloat16)
    ones_bd = jnp.kron(jnp.eye(GROUPS, dtype=jnp.float32),
                       jnp.ones((H, H), jnp.float32)).astype(jnp.bfloat16)
    b_t = jnp.tile(b_c, GROUPS).reshape(1, 128)
    g_t = jnp.tile(gamma.astype(jnp.float32), GROUPS).reshape(1, 128)
    beta_t = jnp.tile(beta.astype(jnp.float32), GROUPS).reshape(1, 128)

    # ---- sublane tile: multiple of 8, clamped to the array; default 1024 (= 32768 rows) ----
    tile = max(8, min(int(tile_s), rg))
    tile = (tile // 8) * 8
    if tile >= rg:
        tile = rg
    grid = (pl.cdiv(rg, tile),)

    mat_spec = pl.BlockSpec((128, 128), lambda i: (0, 0))
    vec_spec = pl.BlockSpec((1, 128), lambda i: (0, 0))

    out = pl.pallas_call(
        _bert_ln_gelu_kernel,
        out_shape=jax.ShapeDtypeStruct((rg, 128), jnp.float32),
        grid=grid,
        in_specs=[
            mat_spec,                                   # wbd_hi
            mat_spec,                                   # wbd_lo
            mat_spec,                                   # ones block-diag
            vec_spec,                                   # centered bias, tiled
            vec_spec,                                   # gamma, tiled
            vec_spec,                                   # beta, tiled
            pl.BlockSpec((tile, 128), lambda i: (i, 0)),  # x block
        ],
        out_specs=pl.BlockSpec((tile, 128), lambda i: (i, 0)),
        compiler_params=pltpu.CompilerParams(
            dimension_semantics=("parallel",),          # shard row tiles across TCs (v7x)
            vmem_limit_bytes=32 * 1024 * 1024,
        ),
    )(wbd_hi, wbd_lo, ones_bd, b_t, g_t, beta_t, xg)

    y = out.reshape(r_pad, H)
    if r_pad != R:
        y = y[:R]
    return y.reshape(B, S, H).astype(orig_dtype)


def _reference(x, w, b, gamma, beta):
    # Pure elementwise f32 reference (no matmul, so no backend matmul-precision effects).
    xf = x.astype(jnp.float32)
    y = jnp.sum(xf[..., None, :] * w[None, None, :, :], axis=-1) + b
    mean = jnp.mean(y, axis=-1, keepdims=True)
    var = jnp.mean((y - mean) ** 2, axis=-1, keepdims=True)
    yn = (y - mean) / jnp.sqrt(var + LN_EPS) * gamma + beta
    return 0.5 * yn * (1.0 + jax.lax.erf(yn * INV_SQRT2))


if __name__ == "__main__":
    key = jax.random.PRNGKey(0)
    kw, kb, kg, kbeta, kx1, kx2, kx3 = jax.random.split(key, 7)

    # Parameters mirroring torch.nn.Linear init range (uniform(-1/sqrt(4), 1/sqrt(4)))
    bound = 0.5
    w = jax.random.uniform(kw, (H, H), minval=-bound, maxval=bound, dtype=jnp.float32)
    b = jax.random.uniform(kb, (H,), minval=-bound, maxval=bound, dtype=jnp.float32)
    gamma = 1.0 + 0.2 * jax.random.normal(kg, (H,), dtype=jnp.float32)
    beta = 0.1 * jax.random.normal(kbeta, (H,), dtype=jnp.float32)

    fn = jax.jit(bert_ln_gelu, static_argnames=("tile_s",))

    # 1) tiny shape -- exercises the row-padding path (R=16 padded to 256, single grid step)
    x1 = jax.random.normal(kx1, (2, 8, H), dtype=jnp.float32)
    o1 = fn(x1, w, b, gamma, beta)
    jax.block_until_ready(o1)
    assert o1.shape == x1.shape
    assert jnp.allclose(o1, _reference(x1, w, b, gamma, beta), atol=2e-4, rtol=2e-4), \
        "mismatch vs reference (tiny / padded)"

    # 2) BERT-ish shape -- zero-copy layout path (R=768 is a multiple of 256)
    x2 = jax.random.normal(kx2, (2, 384, H), dtype=jnp.float32)
    o2 = fn(x2, w, b, gamma, beta)
    jax.block_until_ready(o2)
    assert jnp.allclose(o2, _reference(x2, w, b, gamma, beta), atol=2e-4, rtol=2e-4), \
        "mismatch vs reference (bert-ish)"

    # 3) multi-step pipelined grid (R=2048 -> Rg=64 sublane rows, tile_s=16 -> 4 grid steps)
    x3 = jax.random.normal(kx3, (4, 512, H), dtype=jnp.float32)
    o3 = fn(x3, w, b, gamma, beta, tile_s=16)
    jax.block_until_ready(o3)
    assert jnp.allclose(o3, _reference(x3, w, b, gamma, beta), atol=2e-4, rtol=2e-4), \
        "mismatch vs reference (gridded)"

    print("KERNEL_OK")
</pallas_src>

<mosaic_0001>
module attributes {stable_mosaic.version = 11 : i64} {
  func.func @_bert_ln_gelu_kernel(%arg0: i32, %arg1: memref<128x128xbf16, #tpu.memory_space<vmem>>, %arg2: memref<128x128xbf16, #tpu.memory_space<vmem>>, %arg3: memref<128x128xbf16, #tpu.memory_space<vmem>>, %arg4: memref<1x128xf32, #tpu.memory_space<vmem>>, %arg5: memref<1x128xf32, #tpu.memory_space<vmem>>, %arg6: memref<1x128xf32, #tpu.memory_space<vmem>>, %arg7: memref<8x128xf32, #tpu.memory_space<vmem>>, %arg8: memref<8x128xf32, #tpu.memory_space<vmem>>) attributes {dimension_semantics = [#tpu.dimension_semantics<parallel>], iteration_bounds = array<i64: 1>, scalar_prefetch = 0 : i64, scratch_operands = 0 : i64, tpu.core_type = #tpu.core_type<tc>, window_params = [{pipeline_mode = #tpu.pipeline_mode<synchronous>, transform_indices = @transform_0, window_bounds = array<i64: 128, 128>}, {pipeline_mode = #tpu.pipeline_mode<synchronous>, transform_indices = @transform_1, window_bounds = array<i64: 128, 128>}, {pipeline_mode = #tpu.pipeline_mode<synchronous>, transform_indices = @transform_2, window_bounds = array<i64: 128, 128>}, {pipeline_mode = #tpu.pipeline_mode<synchronous>, transform_indices = @transform_3, window_bounds = array<i64: 1, 128>}, {pipeline_mode = #tpu.pipeline_mode<synchronous>, transform_indices = @transform_4, window_bounds = array<i64: 1, 128>}, {pipeline_mode = #tpu.pipeline_mode<synchronous>, transform_indices = @transform_5, window_bounds = array<i64: 1, 128>}, {transform_indices = @transform_6, window_bounds = array<i64: 8, 128>}, {transform_indices = @transform_7, window_bounds = array<i64: 8, 128>}]} {
    %c0 = arith.constant 0 : index
    %c0_0 = arith.constant 0 : index
    %0 = vector.load %arg7[%c0, %c0_0] : memref<8x128xf32, #tpu.memory_space<vmem>>, vector<8x128xf32>
    %1 = arith.truncf %0 : vector<8x128xf32> to vector<8x128xbf16>
    %2 = arith.extf %1 : vector<8x128xbf16> to vector<8x128xf32>
    %3 = arith.subf %0, %2 : vector<8x128xf32>
    %4 = arith.truncf %3 : vector<8x128xf32> to vector<8x128xbf16>
    %c0_1 = arith.constant 0 : index
    %c0_2 = arith.constant 0 : index
    %5 = vector.load %arg1[%c0_1, %c0_2] : memref<128x128xbf16, #tpu.memory_space<vmem>>, vector<128x128xbf16>
    %c0_3 = arith.constant 0 : index
    %c0_4 = arith.constant 0 : index
    %6 = vector.load %arg2[%c0_3, %c0_4] : memref<128x128xbf16, #tpu.memory_space<vmem>>, vector<128x128xbf16>
    %cst = arith.constant dense<0.000000e+00> : vector<8x128xf32>
    %7 = tpu.matmul %1, %5, %cst {dimension_numbers = #tpu.dot_dimension_numbers<[1], [0], [0], [1], [0, 0, 1, 1], [], []>} : vector<8x128xbf16>, vector<128x128xbf16>, vector<8x128xf32> -> vector<8x128xf32>
    %cst_5 = arith.constant dense<0.000000e+00> : vector<8x128xf32>
    %8 = tpu.matmul %4, %5, %cst_5 {dimension_numbers = #tpu.dot_dimension_numbers<[1], [0], [0], [1], [0, 0, 1, 1], [], []>} : vector<8x128xbf16>, vector<128x128xbf16>, vector<8x128xf32> -> vector<8x128xf32>
    %9 = arith.addf %7, %8 : vector<8x128xf32>
    %cst_6 = arith.constant dense<0.000000e+00> : vector<8x128xf32>
    %10 = tpu.matmul %1, %6, %cst_6 {dimension_numbers = #tpu.dot_dimension_numbers<[1], [0], [0], [1], [0, 0, 1, 1], [], []>} : vector<8x128xbf16>, vector<128x128xbf16>, vector<8x128xf32> -> vector<8x128xf32>
    %11 = arith.addf %9, %10 : vector<8x128xf32>
    %cst_7 = arith.constant dense<0.000000e+00> : vector<8x128xf32>
    %12 = tpu.matmul %4, %6, %cst_7 {dimension_numbers = #tpu.dot_dimension_numbers<[1], [0], [0], [1], [0, 0, 1, 1], [], []>} : vector<8x128xbf16>, vector<128x128xbf16>, vector<8x128xf32> -> vector<8x128xf32>
    %13 = arith.addf %11, %12 : vector<8x128xf32>
    %c0_8 = arith.constant 0 : index
    %c0_9 = arith.constant 0 : index
    %14 = vector.load %arg4[%c0_8, %c0_9] : memref<1x128xf32, #tpu.memory_space<vmem>>, vector<1x128xf32>
    %15 = vector.broadcast %14 : vector<1x128xf32> to vector<8x128xf32>
    %16 = arith.addf %13, %15 : vector<8x128xf32>
    %17 = arith.mulf %16, %16 : vector<8x128xf32>
    %18 = arith.truncf %17 : vector<8x128xf32> to vector<8x128xbf16>
    %19 = arith.extf %18 : vector<8x128xbf16> to vector<8x128xf32>
    %20 = arith.subf %17, %19 : vector<8x128xf32>
    %21 = arith.truncf %20 : vector<8x128xf32> to vector<8x128xbf16>
    %c0_10 = arith.constant 0 : index
    %c0_11 = arith.constant 0 : index
    %22 = vector.load %arg3[%c0_10, %c0_11] : memref<128x128xbf16, #tpu.memory_space<vmem>>, vector<128x128xbf16>
    %cst_12 = arith.constant dense<0.000000e+00> : vector<8x128xf32>
    %23 = tpu.matmul %18, %22, %cst_12 {dimension_numbers = #tpu.dot_dimension_numbers<[1], [0], [0], [1], [0, 0, 1, 1], [], []>} : vector<8x128xbf16>, vector<128x128xbf16>, vector<8x128xf32> -> vector<8x128xf32>
    %cst_13 = arith.constant dense<0.000000e+00> : vector<8x128xf32>
    %24 = tpu.matmul %21, %22, %cst_13 {dimension_numbers = #tpu.dot_dimension_numbers<[1], [0], [0], [1], [0, 0, 1, 1], [], []>} : vector<8x128xbf16>, vector<128x128xbf16>, vector<8x128xf32> -> vector<8x128xf32>
    %25 = arith.addf %23, %24 : vector<8x128xf32>
    %cst_14 = arith.constant 2.500000e-01 : f32
    %26 = vector.broadcast %cst_14 : f32 to vector<8x128xf32>
    %27 = arith.mulf %25, %26 : vector<8x128xf32>
    %cst_15 = arith.constant 9.99999974E-6 : f32
    %28 = vector.broadcast %cst_15 : f32 to vector<8x128xf32>
    %29 = arith.addf %27, %28 : vector<8x128xf32>
    %30 = math.rsqrt %29 : vector<8x128xf32>
    %31 = arith.mulf %16, %30 : vector<8x128xf32>
    %c0_16 = arith.constant 0 : index
    %c0_17 = arith.constant 0 : index
    %32 = vector.load %arg5[%c0_16, %c0_17] : memref<1x128xf32, #tpu.memory_space<vmem>>, vector<1x128xf32>
    %33 = vector.broadcast %32 : vector<1x128xf32> to vector<8x128xf32>
    %34 = arith.mulf %31, %33 : vector<8x128xf32>
    %c0_18 = arith.constant 0 : index
    %c0_19 = arith.constant 0 : index
    %35 = vector.load %arg6[%c0_18, %c0_19] : memref<1x128xf32, #tpu.memory_space<vmem>>, vector<1x128xf32>
    %36 = vector.broadcast %35 : vector<1x128xf32> to vector<8x128xf32>
    %37 = arith.addf %34, %36 : vector<8x128xf32>
    %cst_20 = arith.constant 5.000000e-01 : f32
    %38 = vector.broadcast %cst_20 : f32 to vector<8x128xf32>
    %39 = arith.mulf %38, %37 : vector<8x128xf32>
    %cst_21 = arith.constant 0.707106769 : f32
    %40 = vector.broadcast %cst_21 : f32 to vector<8x128xf32>
    %41 = arith.mulf %37, %40 : vector<8x128xf32>
    %42 = math.erf %41 : vector<8x128xf32>
    %cst_22 = arith.constant 1.000000e+00 : f32
    %43 = vector.broadcast %cst_22 : f32 to vector<8x128xf32>
    %44 = arith.addf %43, %42 : vector<8x128xf32>
    %45 = arith.mulf %39, %44 : vector<8x128xf32>
    %c0_23 = arith.constant 0 : index
    %c0_24 = arith.constant 0 : index
    %46 = vector.load %arg8[%c0_23, %c0_24] : memref<8x128xf32, #tpu.memory_space<vmem>>, vector<8x128xf32>
    tpu.vector_store %arg8[%c0_23, %c0_24], %45 {strides = array<i32>} : memref<8x128xf32, #tpu.memory_space<vmem>>, vector<8x128xf32>,
    return
  }
  func.func @transform_0(%arg0: i32) -> (i32, i32) {
    %c0_i32 = arith.constant 0 : i32
    %c0_i32_0 = arith.constant 0 : i32
    %c0_i32_1 = arith.constant 0 : i32
    return %c0_i32, %c0_i32_0 : i32, i32
  }
  func.func @transform_1(%arg0: i32) -> (i32, i32) {
    %c0_i32 = arith.constant 0 : i32
    %c0_i32_0 = arith.constant 0 : i32
    %c0_i32_1 = arith.constant 0 : i32
    return %c0_i32, %c0_i32_0 : i32, i32
  }
  func.func @transform_2(%arg0: i32) -> (i32, i32) {
    %c0_i32 = arith.constant 0 : i32
    %c0_i32_0 = arith.constant 0 : i32
    %c0_i32_1 = arith.constant 0 : i32
    return %c0_i32, %c0_i32_0 : i32, i32
  }
  func.func @transform_3(%arg0: i32) -> (i32, i32) {
    %c0_i32 = arith.constant 0 : i32
    %c0_i32_0 = arith.constant 0 : i32
    %c0_i32_1 = arith.constant 0 : i32
    return %c0_i32, %c0_i32_0 : i32, i32
  }
  func.func @transform_4(%arg0: i32) -> (i32, i32) {
    %c0_i32 = arith.constant 0 : i32
    %c0_i32_0 = arith.constant 0 : i32
    %c0_i32_1 = arith.constant 0 : i32
    return %c0_i32, %c0_i32_0 : i32, i32
  }
  func.func @transform_5(%arg0: i32) -> (i32, i32) {
    %c0_i32 = arith.constant 0 : i32
    %c0_i32_0 = arith.constant 0 : i32
    %c0_i32_1 = arith.constant 0 : i32
    return %c0_i32, %c0_i32_0 : i32, i32
  }
  func.func @transform_6(%arg0: i32) -> (i32, i32) {
    %c0_i32 = arith.constant 0 : i32
    %c0_i32_0 = arith.constant 0 : i32
    return %arg0, %c0_i32 : i32, i32
  }
  func.func @transform_7(%arg0: i32) -> (i32, i32) {
    %c0_i32 = arith.constant 0 : i32
    %c0_i32_0 = arith.constant 0 : i32
    return %arg0, %c0_i32 : i32, i32
  }
}

</mosaic_0001>

<bundles_post_ra>
// kernel: tile.18
= control target key start
LH: loop header
LB: loop body
LE: loop exit
PB: predicated region body
PF: predicated region fallthrough
CT: control target
= control target key end

     0   :  { %s40_s0 = inlined_call_operand.vmem [shape: f32[4], index: 0, kind: input, shape index: {}]   ;;  %s41_s1 = inlined_call_operand.vmem [shape: f32[32,4], index: 1, kind: output, shape index: {}]  }
   0x1   :  { %v4_v0 = vld [vmem:[%s40_s0] ss:$0 sm:$0xff] }
   0x2   :  { %5 = vst [vmem:[%s41_s1] sm:$0xff] %v4_v0 }
   0x3   :  { %12 = vst [vmem:[%s41_s1 + $0x8] sm:$0xff] %v4_v0 }
   0x4   :  { %13 = vst [vmem:[%s41_s1 + $0x10] sm:$0xff] %v4_v0 }
   0x5   :  { %14 = vst [vmem:[%s41_s1 + $0x18] sm:$0xff] %v4_v0 }

// kernel: tile.19
= control target key start
LH: loop header
LB: loop body
LE: loop exit
PB: predicated region body
PF: predicated region fallthrough
CT: control target
= control target key end

     0   :  { %s259_s10 = smov 124   ;;  %s260_s11 = smov 116   ;;  %vm3_vm0 = vcmask 31744   ;;  %vm9_vm1 = vcmask 1048544   ;;  %vm15_vm2 = vcmask 1015744   ;;  %vm21_vm3 = vcmask 982944   ;;  %s399_s0 = inlined_call_operand.vmem [shape: f32[32,4], index: 0, kind: input, shape index: {}]   ;;  %s400_s1 = inlined_call_operand.vmem [shape: f32[1,128], index: 1, kind: output, shape index: {}]  }
   0x1   :  { %v197_v0 = vld [vmem:[%s399_s0 + $0x1f] sm:$0x1]   ;;  %v199_v1 = vld [vmem:[%s399_s0 + $0x1d] sm:$0x1]   ;;  %v201_v2 = vld [vmem:[%s399_s0 + $0x1b] sm:$0x1]  }
   0x2   :  { %7 = vrot.lane.b32.xlu0 %v197_v0, %s259_s10  ;;  %19 = vrot.lane.b32.xlu1 %v199_v1, %s260_s11  ;;  %s261_s14 = smov 108   ;;  %v198_v3 = vld [vmem:[%s399_s0 + $0x1e] sm:$0x1]   ;;  %v200_v4 = vld [vmem:[%s399_s0 + $0x1c] sm:$0x1]   ;;  %s262_s19 = smov 120  }
   0x3   :  { %31 = vrot.lane.b32.xlu2 %v201_v2, %s261_s14  ;;  %s263_s20 = smov 112   ;;  %v202_v5 = vld [vmem:[%s399_s0 + $0x1a] sm:$0x1]   ;;  %s264_s23 = smov 104   ;;  %v203_v6 = vld [vmem:[%s399_s0 + $0x19] sm:$0x1]  }
   0x4   :  { %v204_v7 = vld [vmem:[%s399_s0 + $0x18] sm:$0x1]   ;;  %s265_s28 = smov 100   ;;  %s266_s29 = smov 96   ;;  %v205_v8 = vld [vmem:[%s399_s0 + $0x17] sm:$0x1]  }
   0x5   :  { %s267_s3 = smov 92   ;;  %v206_v9 = vld [vmem:[%s399_s0 + $0x16] sm:$0x1]   ;;  %v207_v10 = vld [vmem:[%s399_s0 + $0x15] sm:$0x1]   ;;  %s268_s8 = smov 88  }
   0x6   :  { %s269_s9 = smov 84   ;;  %v208_v11 = vld [vmem:[%s399_s0 + $0x14] sm:$0x1]   ;;  %s270_s12 = smov 80   ;;  %v209_v12 = vld [vmem:[%s399_s0 + $0x13] sm:$0x1]  }
   0x7   :  { %v210_v13 = vld [vmem:[%s399_s0 + $0x12] sm:$0x1]   ;;  %s271_s17 = smov 76   ;;  %s272_s18 = smov 72   ;;  %v211_v14 = vld [vmem:[%s399_s0 + $0x11] sm:$0x1]  }
   0x8   :  { %s273_s21 = smov 68   ;;  %v212_v15 = vld [vmem:[%s399_s0 + $0x10] sm:$0x1]   ;;  %v213_v16 = vld [vmem:[%s399_s0 + $0xf] sm:$0x1]   ;;  %s274_s26 = smov 64  }
   0x9   :  { %s275_s27 = smov 60   ;;  %v214_v17 = vld [vmem:[%s399_s0 + $0xe] sm:$0x1]   ;;  %s276_s30 = smov 56   ;;  %v215_v18 = vld [vmem:[%s399_s0 + $0xd] sm:$0x1]  }
   0xa   :  { %13 = vrot.lane.b32.xlu0 %v198_v3, %s262_s19  ;;  %25 = vrot.lane.b32.xlu1 %v200_v4, %s263_s20  ;;  %v216_v19 = vld [vmem:[%s399_s0 + $0xc] sm:$0x1]   ;;  %s277_s6 = smov 52   ;;  %s278_s7 = smov 48   ;;  %v217_v20 = vld [vmem:[%s399_s0 + $0xb] sm:$0x1]  }
   0xb   :  { %37 = vrot.lane.b32.xlu2 %v202_v5, %s264_s23  ;;  %s279_s10 = smov 44   ;;  %v218_v21 = vld [vmem:[%s399_s0 + $0xa] sm:$0x1]   ;;  %v219_v22 = vld [vmem:[%s399_s0 + $0x9] sm:$0x1]   ;;  %s280_s15 = smov 40  }
   0xc   :  { %s281_s16 = smov 36   ;;  %v220_v23 = vld [vmem:[%s399_s0 + $0x8] sm:$0x1]   ;;  %s282_s19 = smov 32   ;;  %v221_v24 = vld [vmem:[%s399_s0 + $0x7] sm:$0x1]  }
   0xd   :  { %v222_v25 = vld [vmem:[%s399_s0 + $0x6] sm:$0x1]   ;;  %s283_s24 = smov 28   ;;  %s284_s25 = smov 24   ;;  %v223_v26 = vld [vmem:[%s399_s0 + $0x5] sm:$0x1]  }
   0xe   :  { %v224_v27 = vld [vmem:[%s399_s0 + $0x4] sm:$0x1]   ;;  %v225_v28 = vld [vmem:[%s399_s0 + $0x3] sm:$0x1]   ;;  %s286_s4 = smov 16   ;;  %s287_s5 = smov 12  }
   0xf   :  { %v226_v29 = vld [vmem:[%s399_s0 + $0x2] sm:$0x1]   ;;  %v227_v30 = vld [vmem:[%s399_s0 + $0x1] sm:$0x1]   ;;  %s289_s11 = smov 4   ;;  %vm27_vm4 = vcmask 950144  }
  0x10   :  { %v2_v31 = vld [vmem:[%s399_s0] sm:$0x1]   ;;  %vm33_vm5 = vcmask 917344   ;;  %vm39_vm6 = vcmask 884544   ;;  %vm45_vm7 = vcmask 851744   ;;  %vm51_vm8 = vcmask 818944  }
  0x11   :  { %4 = vst.msk [vmem:[#allocation0] sm:$0x1] %vm3_vm0, %v2_v31   ;;  %vm57_vm9 = vcmask 786144   ;;  %vm63_vm10 = vcmask 753344   ;;  %vm69_vm11 = vcmask 720544   ;;  %vm75_vm12 = vcmask 687744  }
  0x12   :  { %43 = vrot.lane.b32.xlu0 %v203_v6, %s265_s28  ;;  %49 = vrot.lane.b32.xlu1 %v204_v7, %s266_s29  ;;  %s285_s28 = smov 20   ;;  %vm81_vm13 = vcmask 654944   ;;  %vm87_vm14 = vcmask 622144   ;;  %vm93_vm15 = vcmask 589344   ;;  %vm99_vm0 = vcmask 556544  }
  0x13   :  { %55 = vrot.lane.b32.xlu2 %v205_v8, %s267_s3 }
  0x1a   :  { %61 = vrot.lane.b32.xlu0 %v206_v9, %s268_s8  ;;  %67 = vrot.lane.b32.xlu1 %v207_v10, %s269_s9  ;;  %s288_s8 = smov 8  }
  0x1b   :  { %73 = vrot.lane.b32.xlu2 %v208_v11, %s270_s12 }
  0x22   :  { %79 = vrot.lane.b32.xlu0 %v209_v12, %s271_s17  ;;  %85 = vrot.lane.b32.xlu1 %v210_v13, %s272_s18 }
  0x23   :  { %91 = vrot.lane.b32.xlu2 %v211_v14, %s273_s21 }
  0x2a   :  { %97 = vrot.lane.b32.xlu0 %v212_v15, %s274_s26  ;;  %103 = vrot.lane.b32.xlu1 %v213_v16, %s275_s27 }
  0x2b   :  { %109 = vrot.lane.b32.xlu2 %v214_v17, %s276_s30 }
  0x32   :  { %115 = vrot.lane.b32.xlu0 %v215_v18, %s277_s6  ;;  %121 = vrot.lane.b32.xlu1 %v216_v19, %s278_s7 }
  0x33   :  { %127 = vrot.lane.b32.xlu2 %v217_v20, %s279_s10 }
  0x3a   :  { %133 = vrot.lane.b32.xlu0 %v218_v21, %s280_s15  ;;  %139 = vrot.lane.b32.xlu1 %v219_v22, %s281_s16 }
  0x3b   :  { %145 = vrot.lane.b32.xlu2 %v220_v23, %s282_s19 }
  0x42   :  { %151 = vrot.lane.b32.xlu0 %v221_v24, %s283_s24  ;;  %157 = vrot.lane.b32.xlu1 %v222_v25, %s284_s25 }
  0x43   :  { %163 = vrot.lane.b32.xlu2 %v223_v26, %s285_s28 }
  0x4a   :  { %169 = vrot.lane.b32.xlu0 %v224_v27, %s286_s4  ;;  %175 = vrot.lane.b32.xlu1 %v225_v28, %s287_s5 }
  0x4b   :  { %181 = vrot.lane.b32.xlu2 %v226_v29, %s288_s8 }
  0x52   :  { %187 = vrot.lane.b32.xlu0 %v227_v30, %s289_s11 }
  0x5d   :  { %v32_v32 = vpop.permute.xlu2 %31  }
  0x65   :  { %v38_v33 = vpop.permute.xlu2 %37  }
  0x6d   :  { %v56_v34 = vpop.permute.xlu2 %55  }
  0x74   :  { %v8_v35 = vpop.permute.xlu0 %7   ;;  %v20_v36 = vpop.permute.xlu1 %19  }
  0x75   :  { %10 = vst.msk [vmem:[#allocation0] sm:$0x1] %vm9_vm1, %v8_v35   ;;  %v74_v37 = vpop.permute.xlu2 %73   ;;  %vm105_vm1 = vcmask 523744  }
  0x7c   :  { %v14_v38 = vpop.permute.xlu0 %13   ;;  %v26_v39 = vpop.permute.xlu1 %25  }
  0x7d   :  { %16 = vst.msk [vmem:[#allocation0] sm:$0x1] %vm15_vm2, %v14_v38   ;;  %v92_v40 = vpop.permute.xlu2 %91   ;;  %vm111_vm2 = vcmask 490944  }
  0x7e   :  { %22 = vst.msk [vmem:[#allocation0] sm:$0x1] %vm21_vm3, %v20_v36   ;;  %vm117_vm3 = vcmask 458144  }
  0x7f   :  { %28 = vst.msk [vmem:[#allocation0] sm:$0x1] %vm27_vm4, %v26_v39   ;;  %vm123_vm4 = vcmask 425344  }
  0x80   :  { %34 = vst.msk [vmem:[#allocation0] sm:$0x1] %vm33_vm5, %v32_v32   ;;  %vm129_vm5 = vcmask 392544  }
  0x81   :  { %40 = vst.msk [vmem:[#allocation0] sm:$0x1] %vm39_vm6, %v38_v33   ;;  %vm135_vm6 = vcmask 359744  }
  0x84   :  { %v44_v41 = vpop.permute.xlu0 %43   ;;  %v50_v42 = vpop.permute.xlu1 %49  }
  0x85   :  { %46 = vst.msk [vmem:[#allocation0] sm:$0x1] %vm45_vm7, %v44_v41   ;;  %v110_v43 = vpop.permute.xlu2 %109   ;;  %vm141_vm7 = vcmask 326944  }
  0x86   :  { %52 = vst.msk [vmem:[#allocation0] sm:$0x1] %vm51_vm8, %v50_v42   ;;  %vm147_vm8 = vcmask 294144  }
  0x87   :  { %58 = vst.msk [vmem:[#allocation0] sm:$0x1] %vm57_vm9, %v56_v34   ;;  %vm153_vm9 = vcmask 261344  }
  0x8c   :  { %v62_v44 = vpop.permute.xlu0 %61   ;;  %v68_v45 = vpop.permute.xlu1 %67  }
  0x8d   :  { %64 = vst.msk [vmem:[#allocation0] sm:$0x1] %vm63_vm10, %v62_v44   ;;  %v128_v46 = vpop.permute.xlu2 %127   ;;  %vm159_vm10 = vcmask 228544  }
  0x8e   :  { %70 = vst.msk [vmem:[#allocation0] sm:$0x1] %vm69_vm11, %v68_v45   ;;  %vm165_vm11 = vcmask 195744  }
  0x8f   :  { %76 = vst.msk [vmem:[#allocation0] sm:$0x1] %vm75_vm12, %v74_v37   ;;  %vm171_vm12 = vcmask 162944  }
  0x94   :  { %v80_v47 = vpop.permute.xlu0 %79   ;;  %v86_v48 = vpop.permute.xlu1 %85  }
  0x95   :  { %82 = vst.msk [vmem:[#allocation0] sm:$0x1] %vm81_vm13, %v80_v47   ;;  %v146_v49 = vpop.permute.xlu2 %145   ;;  %vm177_vm13 = vcmask 130144  }
  0x96   :  { %88 = vst.msk [vmem:[#allocation0] sm:$0x1] %vm87_vm14, %v86_v48   ;;  %vm183_vm14 = vcmask 97344  }
  0x97   :  { %94 = vst.msk [vmem:[#allocation0] sm:$0x1] %vm93_vm15, %v92_v40   ;;  %vm189_vm15 = vcmask 64544  }
  0x9c   :  { %v98_v50 = vpop.permute.xlu0 %97   ;;  %v104_v51 = vpop.permute.xlu1 %103  }
  0x9d   :  { %100 = vst.msk [vmem:[#allocation0] sm:$0x1] %vm99_vm0, %v98_v50   ;;  %v164_v52 = vpop.permute.xlu2 %163  }
  0x9e   :  { %106 = vst.msk [vmem:[#allocation0] sm:$0x1] %vm105_vm1, %v104_v51  }
  0x9f   :  { %112 = vst.msk [vmem:[#allocation0] sm:$0x1] %vm111_vm2, %v110_v43  }
  0xa4   :  { %v116_v53 = vpop.permute.xlu0 %115   ;;  %v122_v54 = vpop.permute.xlu1 %121  }
  0xa5   :  { %118 = vst.msk [vmem:[#allocation0] sm:$0x1] %vm117_vm3, %v116_v53   ;;  %v182_v55 = vpop.permute.xlu2 %181  }
  0xa6   :  { %124 = vst.msk [vmem:[#allocation0] sm:$0x1] %vm123_vm4, %v122_v54  }
  0xa7   :  { %130 = vst.msk [vmem:[#allocation0] sm:$0x1] %vm129_vm5, %v128_v46  }
  0xac   :  { %v134_v56 = vpop.permute.xlu0 %133   ;;  %v140_v57 = vpop.permute.xlu1 %139  }
  0xad   :  { %136 = vst.msk [vmem:[#allocation0] sm:$0x1] %vm135_vm6, %v134_v56  }
  0xae   :  { %142 = vst.msk [vmem:[#allocation0] sm:$0x1] %vm141_vm7, %v140_v57  }
  0xaf   :  { %148 = vst.msk [vmem:[#allocation0] sm:$0x1] %vm147_vm8, %v146_v49  }
  0xb4   :  { %v152_v58 = vpop.permute.xlu0 %151   ;;  %v158_v59 = vpop.permute.xlu1 %157  }
  0xb5   :  { %154 = vst.msk [vmem:[#allocation0] sm:$0x1] %vm153_vm9, %v152_v58  }
  0xb6   :  { %160 = vst.msk [vmem:[#allocation0] sm:$0x1] %vm159_vm10, %v158_v59  }
  0xb7   :  { %166 = vst.msk [vmem:[#allocation0] sm:$0x1] %vm165_vm11, %v164_v52  }
  0xbc   :  { %v170_v60 = vpop.permute.xlu0 %169   ;;  %v176_v61 = vpop.permute.xlu1 %175  }
  0xbd   :  { %172 = vst.msk [vmem:[#allocation0] sm:$0x1] %vm171_vm12, %v170_v60  }
  0xbe   :  { %178 = vst.msk [vmem:[#allocation0] sm:$0x1] %vm177_vm13, %v176_v61  }
  0xbf   :  { %184 = vst.msk [vmem:[#allocation0] sm:$0x1] %vm183_vm14, %v182_v55  }
  0xc4   :  { %v188_v62 = vpop.permute.xlu0 %187  }
  0xc5   :  { %190 = vst.msk [vmem:[#allocation0] sm:$0x1] %vm189_vm15, %v188_v62  }
  0xcc   :  { %v193_v63 = vld [vmem:[#allocation0] sm:$0x1] }
  0xcd   :  { %196 = vst [vmem:[%s400_s1] sm:$0x1] %v193_v63 }

// kernel: bert_ln_gelu.1
= control target key start
LH: loop header
LB: loop body
LE: loop exit
PB: predicated region body
PF: predicated region fallthrough
CT: control target
= control target key end

     0   :  { %s640_s0 = inlined_call_operand.vmem [shape: bf16[128,128], index: 0, kind: input, shape index: {}]   ;;  %s641_s1 = inlined_call_operand.vmem [shape: bf16[128,128], index: 1, kind: input, shape index: {}]   ;;  %s642_s6 = inlined_call_operand.vmem [shape: f32[8,128], index: 6, kind: input, shape index: {}]   ;;  %s643_s2 = inlined_call_operand.vmem [shape: bf16[128,128], index: 2, kind: input, shape index: {}]   ;;  %s644_s3 = inlined_call_operand.vmem [shape: f32[1,128], index: 3, kind: input, shape index: {}]   ;;  %s645_s4 = inlined_call_operand.vmem [shape: f32[1,128], index: 4, kind: input, shape index: {}]   ;;  %s646_s5 = inlined_call_operand.vmem [shape: f32[1,128], index: 5, kind: input, shape index: {}]   ;;  %s647_s7 = inlined_call_operand.vmem [shape: f32[8,128], index: 7, kind: output, shape index: {}]  }
   0x1   :  { %v489_v0 = vld [vmem:[%s640_s0 + $0x38] sm:$0xff]  ;;  %v488_v2 = vld [vmem:[%s640_s0 + $0x30] sm:$0xff]  ;;  %v487_v4 = vld [vmem:[%s640_s0 + $0x28] sm:$0xff] }
   0x2   :  { %v497_v1 = vld [vmem:[%s641_s1 + $0x38] sm:$0xff]  ;;  %111 = vmatpush.bf16.msra.mxu0 %v489_v0  ;;  %124 = vmatpush.bf16.msra.mxu1 %v489_v0  ;;  %v496_v3 = vld [vmem:[%s641_s1 + $0x30] sm:$0xff]  ;;  %v495_v5 = vld [vmem:[%s641_s1 + $0x28] sm:$0xff] }
   0x3   :  { %185 = vmatpush.bf16.msra.mxu2 %v497_v1  ;;  %199 = vmatpush.bf16.msra.mxu3 %v497_v1  ;;  %v486_v6 = vld [vmem:[%s640_s0 + $0x20] sm:$0xff]  ;;  %v485_v8 = vld [vmem:[%s640_s0 + $0x18] sm:$0xff]  ;;  %v484_v12 = vld [vmem:[%s640_s0 + $0x10] sm:$0xff] }
   0x4   :  { %v494_v7 = vld [vmem:[%s641_s1 + $0x20] sm:$0xff]  ;;  %v493_v10 = vld [vmem:[%s641_s1 + $0x18] sm:$0xff]  ;;  %v492_v13 = vld [vmem:[%s641_s1 + $0x10] sm:$0xff] }
   0x5   :  { %v26_v9 = vld [vmem:[%s642_s6] sm:$0xff]  ;;  %v483_v15 = vld [vmem:[%s640_s0 + $0x8] sm:$0xff]  ;;  %v505_v20 = vld [vmem:[%s643_s2 + $0x38] sm:$0xff] }
   0x6   :  { %112 = vmatpush.bf16.msra.mxu0 %v488_v2  ;;  %125 = vmatpush.bf16.msra.mxu1 %v488_v2  ;;  %v27_v11 = vpack.c.bf16 %v26_v9, %v26_v9  ;;  %v491_v16 = vld [vmem:[%s641_s1 + $0x8] sm:$0xff]  ;;  %v482_v18 = vld [vmem:[%s640_s0] sm:$0xff]  ;;  %v504_v22 = vld [vmem:[%s643_s2 + $0x30] sm:$0xff] }
   0x7   :  { %186 = vmatpush.bf16.msra.mxu2 %v496_v3  ;;  %200 = vmatpush.bf16.msra.mxu3 %v496_v3  ;;  %v490_v19 = vld [vmem:[%s641_s1] sm:$0xff]  ;;  %v503_v23 = vld [vmem:[%s643_s2 + $0x28] sm:$0xff]  ;;  %v501_v25 = vld [vmem:[%s643_s2 + $0x18] sm:$0xff] }
   0x8   :  { %v28_v14 = vunpack.c.l.bf16 %v27_v11  ;;  %v502_v24 = vld [vmem:[%s643_s2 + $0x20] sm:$0xff]  ;;  %v500_v26 = vld [vmem:[%s643_s2 + $0x10] sm:$0xff]  ;;  %v499_v27 = vld [vmem:[%s643_s2 + $0x8] sm:$0xff] }
   0x9   :  { %v498_v28 = vld [vmem:[%s643_s2] sm:$0xff] }
   0xa   :  { %113 = vmatpush.bf16.msra.mxu0 %v487_v4  ;;  %126 = vmatpush.bf16.msra.mxu1 %v487_v4  ;;  %v29_v17 = vsub.f32 %v26_v9, %v28_v14  ;;  %v506_v35 = vld [vmem:[%s644_s3] ss:$0 sm:$0xff] }
   0xb   :  { %187 = vmatpush.bf16.msra.mxu2 %v495_v5  ;;  %201 = vmatpush.bf16.msra.mxu3 %v495_v5  ;;  %v507_v60 = vld [vmem:[%s645_s4] ss:$0 sm:$0xff] }
   0xc   :  { %v30_v21 = vpack.c.bf16 %v29_v17, %v29_v17  ;;  %v508_v63 = vld [vmem:[%s646_s5] ss:$0 sm:$0xff] }
   0xe   :  { %114 = vmatpush.bf16.msra.mxu0 %v486_v6  ;;  %127 = vmatpush.bf16.msra.mxu1 %v486_v6 }
   0xf   :  { %188 = vmatpush.bf16.msra.mxu2 %v494_v7  ;;  %202 = vmatpush.bf16.msra.mxu3 %v494_v7 }
  0x12   :  { %115 = vmatpush.bf16.msra.mxu0 %v485_v8  ;;  %128 = vmatpush.bf16.msra.mxu1 %v485_v8 }
  0x13   :  { %189 = vmatpush.bf16.msra.mxu2 %v493_v10  ;;  %203 = vmatpush.bf16.msra.mxu3 %v493_v10 }
  0x16   :  { %116 = vmatpush.bf16.msra.mxu0 %v484_v12  ;;  %129 = vmatpush.bf16.msra.mxu1 %v484_v12 }
  0x17   :  { %190 = vmatpush.bf16.msra.mxu2 %v492_v13  ;;  %204 = vmatpush.bf16.msra.mxu3 %v492_v13 }
  0x1a   :  { %117 = vmatpush.bf16.msra.mxu0 %v483_v15  ;;  %130 = vmatpush.bf16.msra.mxu1 %v483_v15 }
  0x1b   :  { %191 = vmatpush.bf16.msra.mxu2 %v491_v16  ;;  %205 = vmatpush.bf16.msra.mxu3 %v491_v16 }
  0x1e   :  { %118 = vmatpush.bf16.msra.mxu0 %v482_v18  ;;  %131 = vmatpush.bf16.msra.mxu1 %v482_v18 }
  0x1f   :  { %192 = vmatpush.bf16.msra.mxu2 %v490_v19  ;;  %206 = vmatpush.bf16.msra.mxu3 %v490_v19 }
  0x21   :  { %119 = vmatmul.bf16.vlgmr.msra.gmra.mxu0 %v30_v21  ;;  %132 = vmatmul.bf16.vlgmr.msra.gmra.mxu1 %v27_v11 }
  0x22   :  { %300 = vmatpush.bf16.msrb.mxu1 %v505_v20  ;;  %287 = vmatpush.bf16.msrb.mxu0 %v505_v20 }
  0x23   :  { %193 = vmatmul.bf16.vlgmr.msra.gmra.mxu2 %v27_v11  ;;  %207 = vmatmul.bf16.vlgmr.msra.gmra.mxu3 %v30_v21 }
  0x26   :  { %301 = vmatpush.bf16.msrb.mxu1 %v504_v22  ;;  %288 = vmatpush.bf16.msrb.mxu0 %v504_v22 }
  0x2a   :  { %302 = vmatpush.bf16.msrb.mxu1 %v503_v23  ;;  %289 = vmatpush.bf16.msrb.mxu0 %v503_v23 }
  0x2e   :  { %303 = vmatpush.bf16.msrb.mxu1 %v502_v24  ;;  %290 = vmatpush.bf16.msrb.mxu0 %v502_v24 }
  0x32   :  { %304 = vmatpush.bf16.msrb.mxu1 %v501_v25  ;;  %291 = vmatpush.bf16.msrb.mxu0 %v501_v25 }
  0x36   :  { %305 = vmatpush.bf16.msrb.mxu1 %v500_v26  ;;  %292 = vmatpush.bf16.msrb.mxu0 %v500_v26 }
  0x3a   :  { %306 = vmatpush.bf16.msrb.mxu1 %v499_v27  ;;  %293 = vmatpush.bf16.msrb.mxu0 %v499_v27 }
  0x3e   :  { %307 = vmatpush.bf16.msrb.mxu1 %v498_v28  ;;  %294 = vmatpush.bf16.msrb.mxu0 %v498_v28 }
  0x9e   :  { %v120_v29 = vpop.f32.mrf.mxu0  ;;  %v133_v30 = vpop.f32.mrf.mxu1 }
  0x9f   :  { %v134_v31 = vadd.f32 %v133_v30, %v120_v29 }
  0xa6   :  { %v194_v32 = vpop.f32.mrf.mxu2  ;;  %v208_v33 = vpop.f32.mrf.mxu3 }
  0xa7   :  { %v198_v34 = vadd.f32 %v194_v32, %v134_v31  ;;  %v122_v36 = vpop.f32.mrf.mxu0  ;;  %v135_v37 = vpop.f32.mrf.mxu1 }
  0xa9   :  { %v212_v38 = vadd.f32 %v208_v33, %v198_v34 }
  0xab   :  { %v217_v39 = vadd.f32 %v506_v35, %v212_v38 }
  0xad   :  { %v218_v40 = vmul.f32 %v217_v39, %v217_v39 }
  0xae   :  { %v196_v41 = vpop.f32.mrf.mxu2  ;;  %v210_v42 = vpop.f32.mrf.mxu3 }
  0xaf   :  { %v219_v43 = vpack.c.bf16 %v218_v40, %v218_v40 }
  0xb1   :  { %v220_v44 = vunpack.c.l.bf16 %v219_v43  ;;  %308 = vmatmul.bf16.vlgmr.msrb.gmra.mxu1 %v219_v43 }
  0xb3   :  { %v221_v45 = vsub.f32 %v218_v40, %v220_v44 }
  0xb5   :  { %v222_v46 = vpack.c.bf16 %v221_v45, %v221_v45 }
  0xb7   :  { %295 = vmatmul.bf16.vlgmr.msrb.gmra.mxu0 %v222_v46 }
 0x12e   :  { %v309_v47 = vpop.f32.mrf.mxu1 }
 0x134   :  { %v296_v48 = vpop.f32.mrf.mxu0 }
 0x135   :  { %v310_v49 = vadd.f32 %v309_v47, %v296_v48 }
 0x136   :  { %v311_v50 = vpop.f32.mrf.mxu1 }
 0x137   :  { %v313_v51 = vmul.f32 0.25, %v310_v49 }
 0x139   :  { %v314_v52 = vadd.f32 1e-05, %v313_v51 }
 0x13b   :  { %509 = vrsqrt.f32 %v314_v52  ;;  %vm321_vm1 = vweird.f32 %v314_v52 }
 0x13c   :  { %v298_v53 = vpop.f32.mrf.mxu0 }
 0x141   :  { %v510_v54 = vpop.eup %509 }
 0x142   :  { %v316_v55 = vmul.f32 %v510_v54, %v314_v52  ;;  %vm322_vm0 = vweird.f32 %v510_v54 }
 0x143   :  { %vm323_vm2 = vmor %vm321_vm1, %vm322_vm0 }
 0x144   :  { %v317_v56 = vmul.f32 %v510_v54, %v316_v55 }
 0x146   :  { %v318_v57 = vmul.f32 0.5, %v317_v56 }
 0x148   :  { %v319_v58 = vsub.f32 1.5, %v318_v57 }
 0x14a   :  { %v320_v59 = vmul.f32 %v510_v54, %v319_v58 }
 0x14c   :  { %v324_v61 = vsel %vm323_vm2, %v510_v54, %v320_v59 }
 0x14d   :  { %v325_v62 = vmul.f32 %v324_v61, %v217_v39 }
 0x14f   :  { %v330_v0 = vmul.f32 %v507_v60, %v325_v62 }
 0x151   :  { %v335_v1 = vadd.f32 %v508_v63, %v330_v0 }
 0x153   :  { %v337_v2 = vmul.f32 0.70710677, %v335_v1  ;;  %v336_v38 = vmul.f32 0.5, %v335_v1 }
 0x155   :  { %v338_v3 = vmul.f32 %v337_v2, %v337_v2 }
 0x157   :  { %v339_v4 = vmin.f32 %v338_v3, 16.0 }
 0x159   :  { %v340_v5 = vmul.f32 2.1237322e-06, %v339_v4  ;;  %v351_v6 = vmul.f32 3.8918573e-05, %v339_v4 }
 0x15b   :  { %v341_v7 = vadd.f32 0.00028619796, %v340_v5  ;;  %v352_v8 = vadd.f32 0.001143296, %v351_v6 }
 0x15d   :  { %v342_v9 = vmul.f32 %v341_v7, %v339_v4  ;;  %v353_v10 = vmul.f32 %v352_v8, %v339_v4 }
 0x15f   :  { %v354_v11 = vadd.f32 0.014752088, %v353_v10  ;;  %v343_v12 = vadd.f32 0.0036580483, %v342_v9 }
 0x161   :  { %v355_v13 = vmul.f32 %v354_v11, %v339_v4  ;;  %v344_v15 = vmul.f32 %v343_v12, %v339_v4 }
 0x163   :  { %v356_v14 = vadd.f32 0.112945676, %v355_v13  ;;  %v345_v18 = vadd.f32 0.05243302, %v344_v15 }
 0x165   :  { %v357_v16 = vmul.f32 %v356_v14, %v339_v4  ;;  %v346_v21 = vmul.f32 %v345_v18, %v339_v4 }
 0x167   :  { %v358_v17 = vadd.f32 0.4994258, %v357_v16  ;;  %v347_v22 = vadd.f32 0.18741608, %v346_v21 }
 0x169   :  { %v359_v19 = vmul.f32 %v358_v17, %v339_v4  ;;  %v348_v24 = vmul.f32 %v347_v22, %v339_v4 }
 0x16b   :  { %v360_v20 = vadd.f32 1.0, %v359_v19  ;;  %v349_v28 = vadd.f32 1.1283791, %v348_v24 }
 0x16d   :  { %511 = vrcp.f32 %v360_v20  ;;  %v372_v27 = vand.u32 2147483648, %v360_v20  ;;  %v370_v30 = vand.u32 2147483647, %v360_v20  ;;  %vm366_vm4 = vweird.f32 %v360_v20 }
 0x16e   :  { %v350_v33 = vmul.f32 %v349_v28, %v337_v2 }
 0x16f   :  { %v373_v32 = vor.u32 1.1754944e-38, %v372_v27  ;;  %vm371_vm6 = vcmp.eq.f32.partialorder %v370_v30, 8.507059e+37 }
 0x173   :  { %v512_v23 = vpop.eup %511 }
 0x174   :  { %v362_v25 = vmul.f32 %v512_v23, %v360_v20  ;;  %vm367_vm3 = vweird.f32 %v512_v23 }
 0x175   :  { %vm368_vm5 = vmor %vm366_vm4, %vm367_vm3 }
 0x176   :  { %v363_v26 = vsub.f32 1.0, %v362_v25 }
 0x178   :  { %v364_v29 = vmul.f32 %v512_v23, %v363_v26 }
 0x17a   :  { %v365_v31 = vadd.f32 %v512_v23, %v364_v29 }
 0x17c   :  { %v369_v34 = vsel %vm368_vm5, %v512_v23, %v365_v31 }
 0x17d   :  { %v374_v35 = vsel %vm371_vm6, %v373_v32, %v369_v34 }
 0x17e   :  { %v375_v36 = vmul.f32 %v374_v35, %v350_v33 }
 0x180   :  { %v481_v37 = vclamps-f32 %v375_v36, 1.0 }
 0x182   :  { %v378_v39 = vadd.f32 1.0, %v481_v37 }
 0x184   :  { %v379_v40 = vmul.f32 %v378_v39, %v336_v38 }
 0x186   :  { %380 = vst [vmem:[%s647_s7] sm:$0xff] %v379_v40 }

</bundles_post_ra>
